<compile_context>
chip_gen: v5e
topology: v5e:2x2
jax: 0.10.0
libtpu: 0.0.40
codegen_flags: <defaults>
</compile_context>

<pallas_src>
import functools

import jax
import jax.numpy as jnp
from jax.experimental import pallas as pl
from jax.experimental.pallas import tpu as pltpu


def layers_identity(x):
    # TODO(synk): `self.layers` is never defined in the provided
    # SimDecoder.__init__; treated as identity (no parameters to initialize).
    return x


def _round_up(x, m):
    return (x + m - 1) // m * m


def _vmem_budgets():
    """Per-generation (working_budget, vmem_limit) in bytes.

    v5e/v6e have 128 MiB VMEM; v7x only 64 MiB per TensorCore. Budgets are a
    fraction of the reported capacity; the fallback assumes the smallest (v7x).
    """
    try:
        cap = int(pltpu.get_tpu_info().vmem_capacity_bytes)
    except Exception:
        cap = 64 << 20
    working = min((cap * 9) // 16, 80 << 20)    # streaming blocks + carries
    limit = min((cap * 3) // 4, 100 << 20)      # leave compiler-scratch headroom
    return working, limit


# -----------------------------------------------------------------------------
# Phase 1: streaming per-(b, c) unbiased std over the spatial axis.
# grid = (nb, ns); each step DMAs a (b_tile, C, s_tile) block (double-buffered
# by BlockSpec) and accumulates shifted sum / sum-of-squares.
# -----------------------------------------------------------------------------
def _feat_kernel(x_ref, feat_ref, sum_ref, sq_ref, shift_ref, *,
                 s_true, s_tile, ragged):
    """x_ref: (b_tile, C, s_tile); feat/sum/sq: (b_tile, C); shift: (b_tile, C, 1)."""
    s_idx = pl.program_id(1)
    ns = pl.num_programs(1)
    bt, n_ch = x_ref.shape[0], x_ref.shape[1]
    n_full = s_tile // 128          # full 128-lane slabs per block
    rem = s_tile % 128              # >0 only when the whole spatial axis is one block

    @pl.when(s_idx == 0)
    def _init():
        sum_ref[...] = jnp.zeros_like(sum_ref)
        sq_ref[...] = jnp.zeros_like(sq_ref)
        # Per-(b, c) shift (= first spatial sample). Shifted sums avoid the
        # catastrophic cancellation of the naive one-pass variance when
        # |mean| >> std, for one extra VPU subtract per element.
        shift_ref[...] = x_ref[:, :, 0:1].astype(jnp.float32)

    def accumulate(masked):
        shift1 = shift_ref[...]                                   # (bt, n_ch, 1)

        if n_full > 0:
            # Hoisted loop invariants (JAX does not CSE broadcasts in loops).
            shift = jnp.broadcast_to(shift1, (bt, n_ch, 128))
            zero = jnp.zeros((bt, n_ch, 128), jnp.float32)
            base = s_idx * s_tile
            lane = jax.lax.broadcasted_iota(jnp.int32, (1, 1, 128), 2)

            def body(k, carry):
                s_acc, q_acc = carry
                off = pl.multiple_of(k * 128, 128)
                # Cast one 128-lane slab at a time (no block-sized f32 temp);
                # per-lane partials live in the fori_loop carry, so there is no
                # per-slab XLU reduce and no per-slab VMEM writeback.
                xs = x_ref[:, :, pl.ds(off, 128)].astype(jnp.float32) - shift
                if masked:
                    # Zero AFTER the shift so out-of-range lanes add nothing.
                    xs = jnp.where(base + off + lane < s_true, xs, 0.0)
                return s_acc + xs, q_acc + xs * xs

            s_acc, q_acc = jax.lax.fori_loop(0, n_full, body, (zero, zero),
                                             unroll=min(n_full, 8))
            # The only cross-lane (XLU) reduce: once per grid step.
            sum_ref[...] += jnp.sum(s_acc, axis=-1)
            sq_ref[...] += jnp.sum(q_acc, axis=-1)

        if rem:
            # Sub-128-lane tail; only reachable when s_tile == S (single block).
            xt = x_ref[:, :, pl.ds(n_full * 128, rem)].astype(jnp.float32) - shift1
            sum_ref[...] += jnp.sum(xt, axis=-1)
            sq_ref[...] += jnp.sum(xt * xt, axis=-1)

    if ragged:
        # Only the last spatial tile can run past S: mask it there, nowhere else.
        @pl.when(s_idx == ns - 1)
        def _ragged_tile():
            accumulate(True)

        @pl.when(s_idx != ns - 1)
        def _full_tile():
            accumulate(False)
    else:
        accumulate(False)

    @pl.when(s_idx == ns - 1)
    def _finalize():
        n = jnp.float32(s_true)
        s = sum_ref[...]
        var = (sq_ref[...] - s * s / n) / jnp.float32(s_true - 1)
        feat_ref[...] = jnp.sqrt(jnp.maximum(var, 0.0))


# -----------------------------------------------------------------------------
# Phase 2: tiny finalize — center, L2-normalize, gram, clamp.
# -----------------------------------------------------------------------------
def _finalize_kernel(feat_ref, o_ref):
    feat = feat_ref[...]                                            # (B, C) f32
    fc = feat - jnp.mean(feat, axis=1, keepdims=True)
    row_norm = jnp.sqrt(jnp.sum(fc * fc, axis=1, keepdims=True))
    inv = pl.reciprocal(jnp.float32(1e-8) + row_norm, approx=False)  # EUP
    fn = fc * inv
    r = jax.lax.dot_general(                                         # MXU, (B, B)
        fn, fn, (((1,), (1,)), ((), ())),
        preferred_element_type=jnp.float32)
    o_ref[...] = jnp.clip(r, -1.0, 1.0)


def sim_decoder_forward(x, *, working_vmem_budget=None, vmem_limit_bytes=None,
                        max_tile_lanes=32768):
    """x: (B, C, H, W) float (NCHW, as in PyTorch). Returns (B, B) float32."""
    x = layers_identity(x)
    B, C, H, W = x.shape
    # TODO(synk): only the (C > 3 and H > 1) std-feature branch of
    # similarity_matrix is implemented; the flatten branch is not needed here.
    assert C > 3 and H > 1, "kernel implements the (C>3, H>1) std-feature branch"
    S = H * W

    auto_budget, auto_limit = _vmem_budgets()
    working_vmem_budget = auto_budget if working_vmem_budget is None else working_vmem_budget
    vmem_limit_bytes = auto_limit if vmem_limit_bytes is None else vmem_limit_bytes

    # Keep f32/bf16 on the HBM->VMEM path (bf16 ingest halves HBM traffic);
    # anything else (f64, f16, ints) is downcast to f32. Accumulation is f32.
    keep = jnp.dtype(x.dtype) in (jnp.dtype(jnp.float32), jnp.dtype(jnp.bfloat16))
    in_dtype = x.dtype if keep else jnp.float32
    x3 = x.reshape(B, C, S).astype(in_dtype)   # metadata reshape; no extra HBM pass

    # Batch tiling: b_tile = 8 whenever B % 8 == 0, so the "parallel" batch axis
    # has >= 2 blocks for B >= 16 (v7x dual TensorCore) and the per-block VMEM
    # footprint stays small. (feat out-block needs b_tile % 8 == 0 or == B.)
    b_tile = 8 if B % 8 == 0 else B
    nb = B // b_tile
    # TODO(synk): when nb == 1 (B < 16 or B % 8 != 0) a channel-group grid axis
    # would be needed to keep both v7x TensorCores busy in the streaming phase.

    itemsize = jnp.dtype(in_dtype).itemsize
    c_pad_in = _round_up(C, 8 * (4 // itemsize))   # sublane packing of input tile
    c_pad32 = _round_up(C, 8)                      # f32 carry sublane padding

    # VMEM per grid step: double-buffered input block + two (b_tile, C, 128) f32
    # loop carries (VMEM-resident when b_tile*C is large) + slab temporaries.
    fixed = 4 * b_tile * c_pad32 * 128 * 4
    row_bytes = 2 * b_tile * c_pad_in * itemsize   # per-lane cost of the 2 input buffers
    lane_budget = max(working_vmem_budget - fixed, 128 * row_bytes)
    max_lanes = max(128, min(lane_budget // row_bytes // 128 * 128, max_tile_lanes))

    # Spatial tiling (never jnp.pad the input in HBM):
    #  * whole spatial axis fits one block -> block lane dim == S (full dim),
    #    in-kernel sub-128 tail, no masking;
    #  * otherwise prefer the largest 128-multiple divisor of S that fits the
    #    budget (grid divides S exactly, no mask); if only a tiny one exists,
    #    take the largest tile and mask the ragged last tile in-kernel.
    if S <= max_lanes:
        s_tile = S
        ragged = False
    else:
        s_tile = 0
        if S % 128 == 0:
            for cand in range(max_lanes, 127, -128):
                if S % cand == 0:
                    s_tile = cand
                    break
        if s_tile < min(max_lanes, 1024):
            s_tile = max_lanes
        ragged = (S % s_tile) != 0
    ns = pl.cdiv(S, s_tile)

    feat = pl.pallas_call(
        functools.partial(_feat_kernel, s_true=S, s_tile=s_tile, ragged=ragged),
        out_shape=jax.ShapeDtypeStruct((B, C), jnp.float32),
        grid_spec=pltpu.PrefetchScalarGridSpec(
            num_scalar_prefetch=0,
            grid=(nb, ns),
            in_specs=[pl.BlockSpec((b_tile, C, s_tile), lambda b, s: (b, 0, s))],
            out_specs=pl.BlockSpec((b_tile, C), lambda b, s: (b, 0)),
            scratch_shapes=[pltpu.VMEM((b_tile, C), jnp.float32),
                            pltpu.VMEM((b_tile, C), jnp.float32),
                            pltpu.VMEM((b_tile, C, 1), jnp.float32)],
        ),
        compiler_params=pltpu.CompilerParams(
            dimension_semantics=("parallel", "arbitrary"),
            vmem_limit_bytes=vmem_limit_bytes,
        ),
        # TODO(synk): if v7x bf16 ingest still trails the HBM roofline, add
        # pipeline_mode=pl.Buffered(3) on the input spec and/or move the spatial
        # reduction onto the MXU (dot_general against a ones vector).
    )(x3)

    return pl.pallas_call(
        _finalize_kernel,
        out_shape=jax.ShapeDtypeStruct((B, B), jnp.float32),
        in_specs=[pl.BlockSpec((B, C), lambda: (0, 0))],
        out_specs=pl.BlockSpec((B, B), lambda: (0, 0)),
    )(feat)


def sim_decoder_reference(x):
    """Pure-JAX reference mirroring the PyTorch semantics."""
    B, C, H, W = x.shape
    z = x.reshape(B, C, -1).astype(jnp.float32)
    feat = jnp.std(z, axis=2, ddof=1)                         # unbiased std, (B, C)
    fc = feat - jnp.mean(feat, axis=1, keepdims=True)
    fn = fc / (1e-8 + jnp.sqrt(jnp.sum(fc * fc, axis=1, keepdims=True)))
    return jnp.clip(fn @ fn.T, -1.0, 1.0)


if __name__ == "__main__":
    key = jax.random.PRNGKey(0)
    cases = [
        # (B, C, H, W, dtype, tol)
        (2, 4, 16, 16, jnp.float32, 1e-4),    # S divisible by 128, single batch block
        (3, 5, 10, 10, jnp.float32, 1e-4),    # S = 100: single full-dim block + tail path
        (16, 4, 16, 24, jnp.bfloat16, 1e-3),  # b_tile = 8 (nb = 2, "parallel"), bf16 ingest
    ]
    for i, (B, C, H, W, dt, tol) in enumerate(cases):
        key, sub = jax.random.split(key)
        x = jax.random.normal(sub, (B, C, H, W), dtype=jnp.float32)
        x = (3.0 + x).astype(dt)              # non-zero mean exercises the shifted sumsq
        out = jax.block_until_ready(sim_decoder_forward(x))
        ref = jax.block_until_ready(sim_decoder_reference(x))
        assert out.shape == (B, B) and out.dtype == jnp.float32
        assert jnp.allclose(out, ref, atol=tol, rtol=tol), (i, out, ref)
    print("KERNEL_OK")
</pallas_src>

<mosaic_0001>
module attributes {stable_mosaic.version = 11 : i64} {
  func.func @_feat_kernel(%arg0: i32, %arg1: i32, %arg2: memref<2x4x256xf32, #tpu.memory_space<vmem>>, %arg3: memref<2x4xf32, #tpu.memory_space<vmem>>, %arg4: memref<2x4xf32, #tpu.memory_space<vmem>>, %arg5: memref<2x4xf32, #tpu.memory_space<vmem>>, %arg6: memref<2x4x1xf32, #tpu.memory_space<vmem>>) attributes {dimension_semantics = [#tpu.dimension_semantics<parallel>, #tpu.dimension_semantics<arbitrary>], iteration_bounds = array<i64: 1, 1>, scalar_prefetch = 0 : i64, scratch_operands = 3 : i64, tpu.core_type = #tpu.core_type<tc>, window_params = [{transform_indices = @transform_0, window_bounds = array<i64: 2, 4, 256>}, {transform_indices = @transform_1, window_bounds = array<i64: 2, 4>}]} {
    %c0_i32 = arith.constant 0 : i32
    %0 = arith.cmpi eq, %arg1, %c0_i32 : i32
    %1 = arith.extui %0 : i1 to i32
    %c0_i32_0 = arith.constant 0 : i32
    %2 = arith.cmpi ne, %1, %c0_i32_0 : i32
    scf.if %2 {
      %cst_21 = arith.constant 0.000000e+00 : f32
      %34 = vector.broadcast %cst_21 : f32 to vector<2x4xf32>
      %c0_22 = arith.constant 0 : index
      %c0_23 = arith.constant 0 : index
      %35 = vector.load %arg4[%c0_22, %c0_23] : memref<2x4xf32, #tpu.memory_space<vmem>>, vector<2x4xf32>
      tpu.vector_store %arg4[%c0_22, %c0_23], %34 {strides = array<i32>} : memref<2x4xf32, #tpu.memory_space<vmem>>, vector<2x4xf32>,
      %cst_24 = arith.constant 0.000000e+00 : f32
      %36 = vector.broadcast %cst_24 : f32 to vector<2x4xf32>
      %c0_25 = arith.constant 0 : index
      %c0_26 = arith.constant 0 : index
      %37 = vector.load %arg5[%c0_25, %c0_26] : memref<2x4xf32, #tpu.memory_space<vmem>>, vector<2x4xf32>
      tpu.vector_store %arg5[%c0_25, %c0_26], %36 {strides = array<i32>} : memref<2x4xf32, #tpu.memory_space<vmem>>, vector<2x4xf32>,
      %c0_27 = arith.constant 0 : index
      %c0_28 = arith.constant 0 : index
      %c0_29 = arith.constant 0 : index
      %38 = vector.load %arg2[%c0_27, %c0_28, %c0_29] : memref<2x4x256xf32, #tpu.memory_space<vmem>>, vector<2x4x1xf32>
      %c0_30 = arith.constant 0 : index
      %c0_31 = arith.constant 0 : index
      %c0_32 = arith.constant 0 : index
      %39 = vector.load %arg6[%c0_30, %c0_31, %c0_32] : memref<2x4x1xf32, #tpu.memory_space<vmem>>, vector<2x4x1xf32>
      tpu.vector_store %arg6[%c0_30, %c0_31, %c0_32], %38 {strides = array<i32>} : memref<2x4x1xf32, #tpu.memory_space<vmem>>, vector<2x4x1xf32>,
    } else {
    }
    %c0 = arith.constant 0 : index
    %c0_1 = arith.constant 0 : index
    %c0_2 = arith.constant 0 : index
    %3 = vector.load %arg6[%c0, %c0_1, %c0_2] : memref<2x4x1xf32, #tpu.memory_space<vmem>>, vector<2x4x1xf32>
    %4 = vector.shape_cast %3 : vector<2x4x1xf32> to vector<2x4x1xf32>
    %5 = vector.broadcast %4 : vector<2x4x1xf32> to vector<2x4x128xf32>
    %cst = arith.constant 0.000000e+00 : f32
    %6 = vector.broadcast %cst : f32 to vector<2x4x128xf32>
    %c0_i32_3 = arith.constant 0 : i32
    %c128_i32 = arith.constant 128 : i32
    %7 = arith.muli %c0_i32_3, %c128_i32 : i32
    %8 = tpu.assume_multiple %7, 128 : i32
    %c0_4 = arith.constant 0 : index
    %c0_5 = arith.constant 0 : index
    %9 = arith.index_cast %8 : i32 to index
    %10 = vector.load %arg2[%c0_4, %c0_5, %9] : memref<2x4x256xf32, #tpu.memory_space<vmem>>, vector<2x4x128xf32>
    %11 = arith.subf %10, %5 : vector<2x4x128xf32>
    %12 = arith.addf %6, %11 : vector<2x4x128xf32>
    %13 = arith.mulf %11, %11 : vector<2x4x128xf32>
    %14 = arith.addf %6, %13 : vector<2x4x128xf32>
    %c1_i32 = arith.constant 1 : i32
    %c128_i32_6 = arith.constant 128 : i32
    %15 = arith.muli %c1_i32, %c128_i32_6 : i32
    %16 = tpu.assume_multiple %15, 128 : i32
    %c0_7 = arith.constant 0 : index
    %c0_8 = arith.constant 0 : index
    %17 = arith.index_cast %16 : i32 to index
    %18 = vector.load %arg2[%c0_7, %c0_8, %17] : memref<2x4x256xf32, #tpu.memory_space<vmem>>, vector<2x4x128xf32>
    %19 = arith.subf %18, %5 : vector<2x4x128xf32>
    %20 = arith.addf %12, %19 : vector<2x4x128xf32>
    %21 = arith.mulf %19, %19 : vector<2x4x128xf32>
    %22 = arith.addf %14, %21 : vector<2x4x128xf32>
    %c2_i32 = arith.constant 2 : i32
    %c0_9 = arith.constant 0 : index
    %c0_10 = arith.constant 0 : index
    %23 = vector.load %arg4[%c0_9, %c0_10] : memref<2x4xf32, #tpu.memory_space<vmem>>, vector<2x4xf32>
    %cst_11 = arith.constant dense<0.000000e+00> : vector<2x4xf32>
    %24 = vector.multi_reduction <add>, %20, %cst_11 [2] : vector<2x4x128xf32> to vector<2x4xf32>
    %25 = arith.addf %23, %24 : vector<2x4xf32>
    %c0_12 = arith.constant 0 : index
    %c0_13 = arith.constant 0 : index
    %26 = vector.load %arg4[%c0_12, %c0_13] : memref<2x4xf32, #tpu.memory_space<vmem>>, vector<2x4xf32>
    tpu.vector_store %arg4[%c0_12, %c0_13], %25 {strides = array<i32>} : memref<2x4xf32, #tpu.memory_space<vmem>>, vector<2x4xf32>,
    %c0_14 = arith.constant 0 : index
    %c0_15 = arith.constant 0 : index
    %27 = vector.load %arg5[%c0_14, %c0_15] : memref<2x4xf32, #tpu.memory_space<vmem>>, vector<2x4xf32>
    %cst_16 = arith.constant dense<0.000000e+00> : vector<2x4xf32>
    %28 = vector.multi_reduction <add>, %22, %cst_16 [2] : vector<2x4x128xf32> to vector<2x4xf32>
    %29 = arith.addf %27, %28 : vector<2x4xf32>
    %c0_17 = arith.constant 0 : index
    %c0_18 = arith.constant 0 : index
    %30 = vector.load %arg5[%c0_17, %c0_18] : memref<2x4xf32, #tpu.memory_space<vmem>>, vector<2x4xf32>
    tpu.vector_store %arg5[%c0_17, %c0_18], %29 {strides = array<i32>} : memref<2x4xf32, #tpu.memory_space<vmem>>, vector<2x4xf32>,
    %c0_i32_19 = arith.constant 0 : i32
    %31 = arith.cmpi eq, %arg1, %c0_i32_19 : i32
    %32 = arith.extui %31 : i1 to i32
    %c0_i32_20 = arith.constant 0 : i32
    %33 = arith.cmpi ne, %32, %c0_i32_20 : i32
    scf.if %33 {
      %c0_21 = arith.constant 0 : index
      %c0_22 = arith.constant 0 : index
      %34 = vector.load %arg4[%c0_21, %c0_22] : memref<2x4xf32, #tpu.memory_space<vmem>>, vector<2x4xf32>
      %c0_23 = arith.constant 0 : index
      %c0_24 = arith.constant 0 : index
      %35 = vector.load %arg5[%c0_23, %c0_24] : memref<2x4xf32, #tpu.memory_space<vmem>>, vector<2x4xf32>
      %36 = arith.mulf %34, %34 : vector<2x4xf32>
      %cst_25 = arith.constant 2.560000e+02 : f32
      %37 = vector.broadcast %cst_25 : f32 to vector<2x4xf32>
      %38 = arith.divf %36, %37 : vector<2x4xf32>
      %39 = arith.subf %35, %38 : vector<2x4xf32>
      %cst_26 = arith.constant 2.550000e+02 : f32
      %40 = vector.broadcast %cst_26 : f32 to vector<2x4xf32>
      %41 = arith.divf %39, %40 : vector<2x4xf32>
      %cst_27 = arith.constant 0.000000e+00 : f32
      %42 = vector.broadcast %cst_27 : f32 to vector<2x4xf32>
      %43 = arith.maximumf %41, %42 : vector<2x4xf32>
      %44 = math.sqrt %43 : vector<2x4xf32>
      %c0_28 = arith.constant 0 : index
      %c0_29 = arith.constant 0 : index
      %45 = vector.load %arg3[%c0_28, %c0_29] : memref<2x4xf32, #tpu.memory_space<vmem>>, vector<2x4xf32>
      tpu.vector_store %arg3[%c0_28, %c0_29], %44 {strides = array<i32>} : memref<2x4xf32, #tpu.memory_space<vmem>>, vector<2x4xf32>,
    } else {
    }
    return
  }
  func.func @transform_0(%arg0: i32, %arg1: i32) -> (i32, i32, i32) {
    %c0_i32 = arith.constant 0 : i32
    %c0_i32_0 = arith.constant 0 : i32
    return %arg0, %c0_i32, %arg1 : i32, i32, i32
  }
  func.func @transform_1(%arg0: i32, %arg1: i32) -> (i32, i32) {
    %c0_i32 = arith.constant 0 : i32
    %c0_i32_0 = arith.constant 0 : i32
    return %arg0, %c0_i32 : i32, i32
  }
}

</mosaic_0001>

<bundles_post_ra>
// kernel: tpu_custom_call.1
= control target key start
LH: loop header
LB: loop body
LE: loop exit
PB: predicated region body
PF: predicated region fallthrough
CT: control target
= control target key end

     0   :  { %6 = vsyncpa [#allocation6], 0  ;;  %s259_s0 = inlined_call_operand.hbm [shape: f32[2,4,256], index: 0, kind: input, shape index: {}]   ;;  %s260_s1 = inlined_call_operand.hbm [shape: f32[2,4], index: 1, kind: output, shape index: {}]  }
   0x1   :  { %7 = vsyncpa [#allocation7], 0  ;;  %s12_s8 = sshll.u32 %s259_s0, 4  ;;  %s226_s9 = smov [#allocation5]   ;;  %s13_s8 = int_to_ptr.hbm [resolvable:$true] %s12_s8 }
   0x2   :  { %s14_s10 = sshll.u32 %s226_s9, 4  ;;  %s227_s11 = smov 128   ;;  %s15_s10 = int_to_ptr.vmem [resolvable:$true] %s14_s10 }
   0x3   :  { %s228_s12 = smov 8  }
   0x4   :  { %20 = dma.hbm_to_vmem [thread:$0]  %s13_s8, 256, %s15_s10, [#allocation6], %s227_s11, %s227_s11, %s228_s12  }
   0x5   :  { %222 = dma.done.wait [#allocation6], 256  }
   0x6   :  { %223 = vsyncadd [#allocation6], 4294967040  ;;  %v229_v0 = vmov 0   ;;  %vm34_vm0 = vcmask 3072   ;;  %v32_v1 = vld [vmem:[#allocation5] sm:$0xf]  ;;  %v80_v31 = vlaneseq }
   0x7   :  { %167 = vset.pattern.permute.xlu0 %v229_v0  ;;  %v33_v2 = vld [vmem:[#allocation5 + $0x8] sm:$0xf]  ;;  %35 = vst.msk [vmem:[#allocation4] sm:$0xf] %vm34_vm0, %v32_v1  ;;  %v49_v5 = vld [vmem:[#allocation5] sm:$0xf] }
   0x8   :  { %36 = vst.msk [vmem:[#allocation4 + $0x4] sm:$0xf] %vm34_vm0, %v33_v2  ;;  %v60_v6 = vld [vmem:[#allocation5 + $0x4] sm:$0xf]  ;;  %vm71_vm1 = vcmask 1043456   ;;  %vm29_vm2 = vcmask 25600  }
   0x9   :  { %v50_v15 = vld [vmem:[#allocation5 + $0x8] sm:$0xf]  ;;  %v61_v16 = vld [vmem:[#allocation5 + $0xc] sm:$0xf]  ;;  %v230_v27 = vmov 0.0   ;;  %v231_v28 = vmov 256.0  }
   0xa   :  { %30 = vst.msk [vmem:[#allocation2] sm:$0x3] %vm29_vm2, %v230_v27  ;;  %168 = vrcp.f32 %v231_v28  ;;  %v232_v30 = vmov 255.0   ;;  %v81_v34 = vand.u32 127, %v80_v31  ;;  %vm84_vm3 = vcmask 1041409   ;;  %s233_s0 = smov [#allocation8]  }
   0xb   :  { %31 = vst.msk [vmem:[#allocation3] sm:$0x3] %vm29_vm2, %v230_v27  ;;  %170 = vrcp.f32 %v232_v30  ;;  %s147_s13 = sshll.u32 %s233_s0, 4  ;;  %s149_s16 = sshll.u32 %s260_s1, 4  ;;  %s148_s13 = int_to_ptr.vmem [resolvable:$true] %s147_s13  ;;  %s150_s16 = int_to_ptr.hbm [resolvable:$true] %s149_s16 }
   0xe   :  { %v37_v3 = vld [vmem:[#allocation4] sm:$0xf] }
   0xf   :  { %41 = vperm.xlu0 %167, %v37_v3   ;;  %v38_v4 = vld [vmem:[#allocation4 + $0x4] sm:$0xf] }
  0x10   :  { %v169_v32 = vpop.eup %168 }
  0x11   :  { %v112_v35 = vmul.f32 256.0, %v169_v32  ;;  %v171_v36 = vpop.eup %170  ;;  %v70_v39 = vld [vmem:[#allocation2] sm:$0x3]  ;;  %vm116_vm4 = vweird.f32 %v169_v32 }
  0x12   :  { %v121_v42 = vmul.f32 255.0, %v171_v36  ;;  %v90_v46 = vld [vmem:[#allocation3] sm:$0x3]  ;;  %vm125_vm5 = vweird.f32 %v171_v36 }
  0x13   :  { %v113_v41 = vsub.f32 1.0, %v112_v35 }
  0x14   :  { %v122_v51 = vsub.f32 1.0, %v121_v42 }
  0x15   :  { %v114_v50 = vmul.f32 %v169_v32, %v113_v41 }
  0x16   :  { %v123_v54 = vmul.f32 %v171_v36, %v122_v51 }
  0x17   :  { %46 = vperm.xlu0 %167, %v38_v4   ;;  %v115_v53 = vadd.f32 %v169_v32, %v114_v50 }
  0x18   :  { %v124_v57 = vadd.f32 %v171_v36, %v123_v54 }
  0x19   :  { %v117_v56 = vsel %vm116_vm4, %v169_v32, %v115_v53 }
  0x1a   :  { %v126_v61 = vsel %vm125_vm5, %v171_v36, %v124_v57 }
  0x81   :  { %v42_v7 = vpop.permute.xlu0 %41 }
  0x82   :  { %v51_v8 = vsub.f32 %v49_v5, %v42_v7  ;;  %v62_v9 = vsub.f32 %v60_v6, %v42_v7 }
  0x84   :  { %v64_v10 = vadd.f32 %v62_v9, %v51_v8  ;;  %v55_v11 = vmul.f32 %v51_v8, %v51_v8  ;;  %v66_v12 = vmul.f32 %v62_v9, %v62_v9 }
  0x86   :  { %v72_v13 = vsel %vm71_vm1, %v64_v10, 0.0  ;;  %v68_v14 = vadd.f32 %v66_v12, %v55_v11 }
  0x87   :  { %73 = vadd.xlane.f32.xlu1 %v72_v13 }
  0x88   :  { %v91_v17 = vsel %vm71_vm1, %v68_v14, 0.0 }
  0x89   :  { %92 = vadd.xlane.f32.xlu2 %v91_v17  ;;  %v47_v18 = vpop.permute.xlu0 %46 }
  0x8a   :  { %v52_v19 = vsub.f32 %v50_v15, %v47_v18  ;;  %v63_v20 = vsub.f32 %v61_v16, %v47_v18 }
  0x8c   :  { %v56_v21 = vmul.f32 %v52_v19, %v52_v19  ;;  %v67_v22 = vmul.f32 %v63_v20, %v63_v20  ;;  %v65_v23 = vadd.f32 %v63_v20, %v52_v19 }
  0x8e   :  { %v75_v24 = vsel %vm71_vm1, %v65_v23, 0.0  ;;  %v69_v25 = vadd.f32 %v67_v22, %v56_v21 }
  0x8f   :  { %76 = vadd.xlane.f32.xlu1 %v75_v24 }
  0x90   :  { %v94_v26 = vsel %vm71_vm1, %v69_v25, 0.0 }
  0x91   :  { %95 = vadd.xlane.f32.xlu2 %v94_v26 }
  0xfa   :  { %v74_v29 = vpop.xlane.xlu1 %73 }
  0xfb   :  { %v82_v38 = vperm.slane %v74_v29, %v81_v34 }
  0xfc   :  { %v93_v33 = vpop.xlane.xlu2 %92 }
  0xfd   :  { %v99_v44 = vperm.slane %v93_v33, %v81_v34 }
 0x102   :  { %v77_v37 = vpop.xlane.xlu1 %76 }
 0x103   :  { %v83_v40 = vperm.slane %v77_v37, %v81_v34 }
 0x104   :  { %v96_v43 = vpop.xlane.xlu2 %95 }
 0x105   :  { %v85_v45 = vsel %vm84_vm3, %v83_v40, %v82_v38  ;;  %v100_v47 = vperm.slane %v96_v43, %v81_v34 }
 0x106   :  { %v87_v48 = vadd.f32 %v85_v45, %v70_v39 }
 0x107   :  { %v101_v49 = vsel %vm84_vm3, %v100_v47, %v99_v44 }
 0x108   :  { %89 = vst.msk [vmem:[#allocation2] sm:$0x3] %vm29_vm2, %v87_v48  ;;  %v103_v52 = vadd.f32 %v101_v49, %v90_v46 }
 0x10a   :  { %104 = vst.msk [vmem:[#allocation3] sm:$0x3] %vm29_vm2, %v103_v52 }
 0x10f   :  { %v108_v55 = vld [vmem:[#allocation2] sm:$0x3] }
 0x110   :  { %v110_v58 = vmul.f32 %v108_v55, %v108_v55 }
 0x111   :  { %v109_v60 = vld [vmem:[#allocation3] sm:$0x3] }
 0x112   :  { %v118_v59 = vmul.f32 %v117_v56, %v110_v58 }
 0x114   :  { %v119_v62 = vsub.f32 %v109_v60, %v118_v59 }
 0x116   :  { %v127_v63 = vmul.f32 %v126_v61, %v119_v62 }
 0x118   :  { %v128_v0 = vmax.f32 %v127_v63, 0.0 }
 0x11a   :  { %172 = vrsqrt.f32 %v128_v0  ;;  %vm136_vm6 = vcmp.eq.f32.partialorder %v128_v0, inf  ;;  %v139_v8 = vand.u32 2147483648, %v128_v0  ;;  %vm138_vm7 = vcmp.eq.f32.partialorder %v128_v0, 0.0 }
 0x120   :  { %v173_v1 = vpop.eup %172 }
 0x121   :  { %v130_v2 = vmul.f32 %v173_v1, %v128_v0 }
 0x123   :  { %v131_v3 = vmul.f32 %v173_v1, %v130_v2 }
 0x125   :  { %v132_v4 = vmul.f32 0.5, %v131_v3 }
 0x127   :  { %v133_v5 = vsub.f32 1.5, %v132_v4 }
 0x129   :  { %v134_v6 = vmul.f32 %v173_v1, %v133_v5 }
 0x12b   :  { %v135_v7 = vmul.f32 %v134_v6, %v128_v0 }
 0x12d   :  { %v137_v9 = vsel %vm136_vm6, %v128_v0, %v135_v7 }
 0x12e   :  { %v140_v10 = vsel %vm138_vm7, %v139_v8, %v137_v9 }
 0x12f   :  { %141 = vst.msk [vmem:[#allocation8] sm:$0x3] %vm29_vm2, %v140_v10 }
 0x130   :  { %152 = dma.vmem_to_hbm [thread:$0]  %s148_s13, 32, %s150_s16, [#allocation7]  }
 0x131   :  { %224 = dma.done.wait [#allocation7], 32  }
 0x132   :  { %225 = vsyncadd [#allocation7], 4294967264 }
 0x133   :  { %157 = vsyncpa [#allocation6], 1 }
 0x134   :  { %158 = vsyncpa [#allocation7], 1 }

</bundles_post_ra>
